<compile_context>
chip_gen: v7x
topology: tpu7x:2x2x1
jax: 0.10.0
libtpu: 0.0.40
codegen_flags: <defaults>
</compile_context>

<pallas_src>
import math

import jax
import jax.numpy as jnp
import numpy as np
from jax.experimental import pallas as pl
from jax.experimental.pallas import tpu as pltpu


def _cdiv(a, b):
    return -(-a // b)


def _round_up(a, m):
    return ((a + m - 1) // m) * m


def _build_interp_matrix(in_size: int, out_size: int) -> np.ndarray:
    """Dense (out_size, in_size) bilinear weight matrix (NumPy, host-side).

    Matches PyTorch align_corners=False / recompute_scale_factor=True:
    output size = floor(in * scale_factor); the coordinate-transform scale is
    then recomputed from the sizes as in_size / out_size.
    """
    scale = in_size / out_size
    dst = np.arange(out_size, dtype=np.float64)
    src = np.maximum((dst + 0.5) * scale - 0.5, 0.0)   # PyTorch clamps to >= 0
    idx0 = np.clip(np.floor(src).astype(np.int64), 0, in_size - 1)
    idx1 = np.minimum(idx0 + 1, in_size - 1)
    lam1 = (src - idx0).astype(np.float32)
    lam0 = (1.0 - lam1).astype(np.float32)
    m = np.zeros((out_size, in_size), np.float32)
    rows = np.arange(out_size)
    np.add.at(m, (rows, idx0), lam0)
    np.add.at(m, (rows, idx1), lam1)
    return m


def _interp_kernel(r_ref, ct_ref, x_ref, o_ref, t_ref):
    # r_ref : (OH, H)     row-pass weights, bf16
    # ct_ref: (W, OW)     column-pass weights (transposed), bf16
    # x_ref : (B, H, W)   batch of input planes, bf16
    # o_ref : (B, OH, OW) output planes, original dtype
    # t_ref : (H, B*OW)   bf16 VMEM scratch: column-pass result with the plane
    #                     batch folded into the lane dimension.
    B, H, W = x_ref.shape
    OH = r_ref.shape[0]
    OW = ct_ref.shape[1]

    # ---- column pass: ONE (B*H, W) @ (W, OW) MXU matmul (f32 accumulate) ---
    x = x_ref[...].reshape(B * H, W)            # merge leading dims: no relayout
    t = jnp.dot(x, ct_ref[...], preferred_element_type=jnp.float32)
    t = t.astype(jnp.bfloat16)                  # (B*H, OW)

    # ---- relayout (B*H, OW) -> (H, B*OW): B static lane-offset stores ------
    for b in range(B):
        t_ref[:, b * OW:(b + 1) * OW] = t[b * H:(b + 1) * H, :]

    # ---- row pass: ONE (OH, H) @ (H, B*OW) MXU matmul ----------------------
    out = jnp.dot(r_ref[...], t_ref[...], preferred_element_type=jnp.float32)
    out = out.astype(o_ref.dtype)               # (OH, B*OW)

    # ---- write per-plane (OH, OW) lane slices back in natural layout -------
    for b in range(B):
        o_ref[b, :, :] = out[:, b * OW:(b + 1) * OW]


def interpolate_bilinear(x: jnp.ndarray, scale_factor: float) -> jnp.ndarray:
    """Bilinear upsample of an NCHW tensor `x` by `scale_factor`."""
    N, C, H, W = x.shape
    OH = int(math.floor(H * scale_factor))
    OW = int(math.floor(W * scale_factor))
    NC = N * C
    out_dtype = x.dtype
    out_it = jnp.dtype(out_dtype).itemsize

    # Constant bf16 weight matrices (MXU-native operands, half the VMEM).
    R = jnp.asarray(_build_interp_matrix(H, OH), dtype=jnp.bfloat16)      # (OH, H)
    Ct = jnp.asarray(_build_interp_matrix(W, OW).T, dtype=jnp.bfloat16)   # (W, OW)

    # bf16 input (one fused XLA cast): halves the kernel's input DMA + VMEM.
    xf = x.reshape(NC, H, W).astype(jnp.bfloat16)

    # ------------- generation-aware plane-batch / VMEM sizing --------------
    kind = ""
    try:
        kind = jax.devices()[0].device_kind.lower()
    except Exception:
        pass
    is_v7x = "7" in kind            # "tpu7x"-style names: 64 MiB VMEM/TC, 2 TCs
    try:
        vmem_cap = int(pltpu.get_tpu_info().vmem_capacity_bytes)
    except Exception:
        vmem_cap = (64 if is_v7x else 128) * 1024 * 1024
    if is_v7x:
        budget = min(28 << 20, int(0.45 * vmem_cap))
        vmem_limit = min(52 << 20, int(0.80 * vmem_cap))
        n_cores = 2
    else:                            # v5e / v6e: 128 MiB VMEM, single TC
        budget = min(72 << 20, int(0.60 * vmem_cap))
        vmem_limit = min(100 << 20, int(0.80 * vmem_cap))
        n_cores = 1

    # Per-plane VMEM, with (sublane, lane) padding of the minor 2-D tile.
    Hp, Wp = _round_up(H, 16), _round_up(W, 128)
    OHp, OWp = _round_up(OH, 16), _round_up(OW, 128)
    per_plane = (
        2 * 2 * Hp * Wp              # input block, bf16, double-buffered
        + 2 * out_it * OHp * OWp     # output block, double-buffered
        + 2 * Hp * Wp                # x value after the leading-dim reshape
        + 6 * Hp * OWp               # column-pass result: f32 + bf16 copies
        + 2 * Hp * OW                # scratch slice (lane-dense in B*OW)
        + (4 + out_it) * OHp * OW    # row-pass f32 result + cast
    )
    fixed = (2 * 2 * (OHp * _round_up(H, 128) + _round_up(W, 16) * OWp)   # R/Ct x2 buffers
             + (4 << 20))                                                 # Mosaic scratch headroom

    fit = max(1, (budget - fixed) // per_plane)
    # Cap B so the two unrolled per-plane store loops stay small; an extra
    # grid step only costs ~0.35 us.
    B = int(min(NC, fit, 128))
    if n_cores > 1:
        # v7x: round the step count up to a multiple of the TC count so the
        # "parallel" grid axis shards evenly over both cores.
        steps = n_cores * _cdiv(_cdiv(NC, B), n_cores)
        B = int(_cdiv(NC, steps))
    steps = _cdiv(NC, B)

    flops = 2 * NC * OW * H * (W + OH)                   # column + row matmuls
    bytes_accessed = (NC * H * W * 2 + NC * OH * OW * out_it
                      + (OH * H + W * OW) * 2)

    out = pl.pallas_call(
        _interp_kernel,
        out_shape=jax.ShapeDtypeStruct((NC, OH, OW), out_dtype),
        grid=(steps,),
        in_specs=[
            pl.BlockSpec((OH, H), lambda i: (0, 0)),
            pl.BlockSpec((W, OW), lambda i: (0, 0)),
            pl.BlockSpec((B, H, W), lambda i: (i, 0, 0)),
        ],
        out_specs=pl.BlockSpec((B, OH, OW), lambda i: (i, 0, 0)),
        scratch_shapes=[pltpu.VMEM((H, B * OW), jnp.bfloat16)],
        compiler_params=pltpu.CompilerParams(
            dimension_semantics=("parallel",),
            vmem_limit_bytes=int(vmem_limit),
        ),
        cost_estimate=pl.CostEstimate(
            flops=flops, transcendentals=0, bytes_accessed=int(bytes_accessed)),
    )(R, Ct, xf)

    return out.reshape(N, C, OH, OW)


def _reference_bilinear(x: jnp.ndarray, scale_factor: float) -> jnp.ndarray:
    """Independent pure-JAX reference: gather-based bilinear interpolation
    mirroring PyTorch's upsample_bilinear2d (align_corners=False,
    recompute_scale_factor=True). Does NOT use the weight-matrix formulation."""
    N, C, H, W = x.shape
    OH = int(math.floor(H * scale_factor))
    OW = int(math.floor(W * scale_factor))

    def src_coords(out_size, in_size):
        scale = in_size / out_size
        d = jnp.arange(out_size, dtype=jnp.float32)
        s = jnp.maximum((d + 0.5) * scale - 0.5, 0.0)
        i0 = jnp.clip(jnp.floor(s).astype(jnp.int32), 0, in_size - 1)
        i1 = jnp.minimum(i0 + 1, in_size - 1)
        l1 = s - i0.astype(jnp.float32)
        return i0, i1, 1.0 - l1, l1

    h0, h1, lh0, lh1 = src_coords(OH, H)
    w0, w1, lw0, lw1 = src_coords(OW, W)

    xf = x.astype(jnp.float32)
    rows = (xf[:, :, h0, :] * lh0[None, None, :, None]
            + xf[:, :, h1, :] * lh1[None, None, :, None])      # (N,C,OH,W)
    out = (rows[:, :, :, w0] * lw0[None, None, None, :]
           + rows[:, :, :, w1] * lw1[None, None, None, :])     # (N,C,OH,OW)
    return out.astype(x.dtype)


if __name__ == "__main__":
    key = jax.random.PRNGKey(0)
    x = jax.random.normal(key, (2, 4, 16, 16), dtype=jnp.float32)  # NCHW
    scale_factor = 2.0

    y = interpolate_bilinear(x, scale_factor)
    y = jax.block_until_ready(y)

    y_ref = _reference_bilinear(x, scale_factor)
    assert y.shape == (2, 4, 32, 32), y.shape
    # bf16 MXU operands vs. an exact f32 reference -> ~1e-3..1e-2 rel. error.
    assert jnp.allclose(y, y_ref, atol=6e-2, rtol=2e-2), float(
        jnp.max(jnp.abs(y - y_ref)))

    print("KERNEL_OK")
</pallas_src>

<mosaic_0001>
module attributes {stable_mosaic.version = 11 : i64} {
  func.func @_interp_kernel(%arg0: i32, %arg1: memref<32x16xbf16, #tpu.memory_space<vmem>>, %arg2: memref<16x32xbf16, #tpu.memory_space<vmem>>, %arg3: memref<8x16x16xbf16, #tpu.memory_space<vmem>>, %arg4: memref<8x32x32xf32, #tpu.memory_space<vmem>>, %arg5: memref<16x256xbf16, #tpu.memory_space<vmem>>) attributes {dimension_semantics = [#tpu.dimension_semantics<parallel>], iteration_bounds = array<i64: 1>, scalar_prefetch = 0 : i64, scratch_operands = 1 : i64, tpu.core_type = #tpu.core_type<tc>, window_params = [{pipeline_mode = #tpu.pipeline_mode<synchronous>, transform_indices = @transform_0, window_bounds = array<i64: 32, 16>}, {pipeline_mode = #tpu.pipeline_mode<synchronous>, transform_indices = @transform_1, window_bounds = array<i64: 16, 32>}, {transform_indices = @transform_2, window_bounds = array<i64: 8, 16, 16>}, {transform_indices = @transform_3, window_bounds = array<i64: 8, 32, 32>}]} {
    %c0 = arith.constant 0 : index
    %c0_0 = arith.constant 0 : index
    %c0_1 = arith.constant 0 : index
    %0 = vector.load %arg3[%c0, %c0_0, %c0_1] : memref<8x16x16xbf16, #tpu.memory_space<vmem>>, vector<8x16x16xbf16>
    %1 = vector.shape_cast %0 : vector<8x16x16xbf16> to vector<128x16xbf16>
    %c0_2 = arith.constant 0 : index
    %c0_3 = arith.constant 0 : index
    %2 = vector.load %arg2[%c0_2, %c0_3] : memref<16x32xbf16, #tpu.memory_space<vmem>>, vector<16x32xbf16>
    %cst = arith.constant dense<0.000000e+00> : vector<128x32xf32>
    %3 = tpu.matmul %1, %2, %cst {dimension_numbers = #tpu.dot_dimension_numbers<[1], [0], [0], [1], [0, 0, 1, 1], [], []>} : vector<128x16xbf16>, vector<16x32xbf16>, vector<128x32xf32> -> vector<128x32xf32>
    %4 = arith.truncf %3 : vector<128x32xf32> to vector<128x32xbf16>
    %5 = vector.extract_strided_slice %4 {offsets = [0, 0], sizes = [16, 32], strides = [1, 1]} : vector<128x32xbf16> to vector<16x32xbf16>
    %c0_4 = arith.constant 0 : index
    %c0_5 = arith.constant 0 : index
    %6 = vector.load %arg5[%c0_4, %c0_5] : memref<16x256xbf16, #tpu.memory_space<vmem>>, vector<16x32xbf16>
    tpu.vector_store %arg5[%c0_4, %c0_5], %5 {strides = array<i32>} : memref<16x256xbf16, #tpu.memory_space<vmem>>, vector<16x32xbf16>,
    %7 = vector.extract_strided_slice %4 {offsets = [16, 0], sizes = [16, 32], strides = [1, 1]} : vector<128x32xbf16> to vector<16x32xbf16>
    %c0_6 = arith.constant 0 : index
    %c32 = arith.constant 32 : index
    %8 = vector.load %arg5[%c0_6, %c32] : memref<16x256xbf16, #tpu.memory_space<vmem>>, vector<16x32xbf16>
    tpu.vector_store %arg5[%c0_6, %c32], %7 {strides = array<i32>} : memref<16x256xbf16, #tpu.memory_space<vmem>>, vector<16x32xbf16>,
    %9 = vector.extract_strided_slice %4 {offsets = [32, 0], sizes = [16, 32], strides = [1, 1]} : vector<128x32xbf16> to vector<16x32xbf16>
    %c0_7 = arith.constant 0 : index
    %c64 = arith.constant 64 : index
    %10 = vector.load %arg5[%c0_7, %c64] : memref<16x256xbf16, #tpu.memory_space<vmem>>, vector<16x32xbf16>
    tpu.vector_store %arg5[%c0_7, %c64], %9 {strides = array<i32>} : memref<16x256xbf16, #tpu.memory_space<vmem>>, vector<16x32xbf16>,
    %11 = vector.extract_strided_slice %4 {offsets = [48, 0], sizes = [16, 32], strides = [1, 1]} : vector<128x32xbf16> to vector<16x32xbf16>
    %c0_8 = arith.constant 0 : index
    %c96 = arith.constant 96 : index
    %12 = vector.load %arg5[%c0_8, %c96] : memref<16x256xbf16, #tpu.memory_space<vmem>>, vector<16x32xbf16>
    tpu.vector_store %arg5[%c0_8, %c96], %11 {strides = array<i32>} : memref<16x256xbf16, #tpu.memory_space<vmem>>, vector<16x32xbf16>,
    %13 = vector.extract_strided_slice %4 {offsets = [64, 0], sizes = [16, 32], strides = [1, 1]} : vector<128x32xbf16> to vector<16x32xbf16>
    %c0_9 = arith.constant 0 : index
    %c128 = arith.constant 128 : index
    %14 = vector.load %arg5[%c0_9, %c128] : memref<16x256xbf16, #tpu.memory_space<vmem>>, vector<16x32xbf16>
    tpu.vector_store %arg5[%c0_9, %c128], %13 {strides = array<i32>} : memref<16x256xbf16, #tpu.memory_space<vmem>>, vector<16x32xbf16>,
    %15 = vector.extract_strided_slice %4 {offsets = [80, 0], sizes = [16, 32], strides = [1, 1]} : vector<128x32xbf16> to vector<16x32xbf16>
    %c0_10 = arith.constant 0 : index
    %c160 = arith.constant 160 : index
    %16 = vector.load %arg5[%c0_10, %c160] : memref<16x256xbf16, #tpu.memory_space<vmem>>, vector<16x32xbf16>
    tpu.vector_store %arg5[%c0_10, %c160], %15 {strides = array<i32>} : memref<16x256xbf16, #tpu.memory_space<vmem>>, vector<16x32xbf16>,
    %17 = vector.extract_strided_slice %4 {offsets = [96, 0], sizes = [16, 32], strides = [1, 1]} : vector<128x32xbf16> to vector<16x32xbf16>
    %c0_11 = arith.constant 0 : index
    %c192 = arith.constant 192 : index
    %18 = vector.load %arg5[%c0_11, %c192] : memref<16x256xbf16, #tpu.memory_space<vmem>>, vector<16x32xbf16>
    tpu.vector_store %arg5[%c0_11, %c192], %17 {strides = array<i32>} : memref<16x256xbf16, #tpu.memory_space<vmem>>, vector<16x32xbf16>,
    %19 = vector.extract_strided_slice %4 {offsets = [112, 0], sizes = [16, 32], strides = [1, 1]} : vector<128x32xbf16> to vector<16x32xbf16>
    %c0_12 = arith.constant 0 : index
    %c224 = arith.constant 224 : index
    %20 = vector.load %arg5[%c0_12, %c224] : memref<16x256xbf16, #tpu.memory_space<vmem>>, vector<16x32xbf16>
    tpu.vector_store %arg5[%c0_12, %c224], %19 {strides = array<i32>} : memref<16x256xbf16, #tpu.memory_space<vmem>>, vector<16x32xbf16>,
    %c0_13 = arith.constant 0 : index
    %c0_14 = arith.constant 0 : index
    %21 = vector.load %arg1[%c0_13, %c0_14] : memref<32x16xbf16, #tpu.memory_space<vmem>>, vector<32x16xbf16>
    %c0_15 = arith.constant 0 : index
    %c0_16 = arith.constant 0 : index
    %22 = vector.load %arg5[%c0_15, %c0_16] : memref<16x256xbf16, #tpu.memory_space<vmem>>, vector<16x256xbf16>
    %cst_17 = arith.constant dense<0.000000e+00> : vector<32x256xf32>
    %23 = tpu.matmul %21, %22, %cst_17 {dimension_numbers = #tpu.dot_dimension_numbers<[1], [0], [0], [1], [0, 0, 1, 1], [], []>} : vector<32x16xbf16>, vector<16x256xbf16>, vector<32x256xf32> -> vector<32x256xf32>
    %24 = vector.extract_strided_slice %23 {offsets = [0, 0], sizes = [32, 32], strides = [1, 1]} : vector<32x256xf32> to vector<32x32xf32>
    %c0_18 = arith.constant 0 : index
    %c0_19 = arith.constant 0 : index
    %c0_20 = arith.constant 0 : index
    %25 = vector.load %arg4[%c0_18, %c0_19, %c0_20] : memref<8x32x32xf32, #tpu.memory_space<vmem>>, vector<1x32x32xf32>
    %26 = vector.shape_cast %25 : vector<1x32x32xf32> to vector<32x32xf32>
    %27 = vector.shape_cast %24 : vector<32x32xf32> to vector<1x32x32xf32>
    tpu.vector_store %arg4[%c0_18, %c0_19, %c0_20], %27 {strides = array<i32>} : memref<8x32x32xf32, #tpu.memory_space<vmem>>, vector<1x32x32xf32>,
    %28 = vector.extract_strided_slice %23 {offsets = [0, 32], sizes = [32, 32], strides = [1, 1]} : vector<32x256xf32> to vector<32x32xf32>
    %c1 = arith.constant 1 : index
    %c0_21 = arith.constant 0 : index
    %c0_22 = arith.constant 0 : index
    %29 = vector.load %arg4[%c1, %c0_21, %c0_22] : memref<8x32x32xf32, #tpu.memory_space<vmem>>, vector<1x32x32xf32>
    %30 = vector.shape_cast %29 : vector<1x32x32xf32> to vector<32x32xf32>
    %31 = vector.shape_cast %28 : vector<32x32xf32> to vector<1x32x32xf32>
    tpu.vector_store %arg4[%c1, %c0_21, %c0_22], %31 {strides = array<i32>} : memref<8x32x32xf32, #tpu.memory_space<vmem>>, vector<1x32x32xf32>,
    %32 = vector.extract_strided_slice %23 {offsets = [0, 64], sizes = [32, 32], strides = [1, 1]} : vector<32x256xf32> to vector<32x32xf32>
    %c2 = arith.constant 2 : index
    %c0_23 = arith.constant 0 : index
    %c0_24 = arith.constant 0 : index
    %33 = vector.load %arg4[%c2, %c0_23, %c0_24] : memref<8x32x32xf32, #tpu.memory_space<vmem>>, vector<1x32x32xf32>
    %34 = vector.shape_cast %33 : vector<1x32x32xf32> to vector<32x32xf32>
    %35 = vector.shape_cast %32 : vector<32x32xf32> to vector<1x32x32xf32>
    tpu.vector_store %arg4[%c2, %c0_23, %c0_24], %35 {strides = array<i32>} : memref<8x32x32xf32, #tpu.memory_space<vmem>>, vector<1x32x32xf32>,
    %36 = vector.extract_strided_slice %23 {offsets = [0, 96], sizes = [32, 32], strides = [1, 1]} : vector<32x256xf32> to vector<32x32xf32>
    %c3 = arith.constant 3 : index
    %c0_25 = arith.constant 0 : index
    %c0_26 = arith.constant 0 : index
    %37 = vector.load %arg4[%c3, %c0_25, %c0_26] : memref<8x32x32xf32, #tpu.memory_space<vmem>>, vector<1x32x32xf32>
    %38 = vector.shape_cast %37 : vector<1x32x32xf32> to vector<32x32xf32>
    %39 = vector.shape_cast %36 : vector<32x32xf32> to vector<1x32x32xf32>
    tpu.vector_store %arg4[%c3, %c0_25, %c0_26], %39 {strides = array<i32>} : memref<8x32x32xf32, #tpu.memory_space<vmem>>, vector<1x32x32xf32>,
    %40 = vector.extract_strided_slice %23 {offsets = [0, 128], sizes = [32, 32], strides = [1, 1]} : vector<32x256xf32> to vector<32x32xf32>
    %c4 = arith.constant 4 : index
    %c0_27 = arith.constant 0 : index
    %c0_28 = arith.constant 0 : index
    %41 = vector.load %arg4[%c4, %c0_27, %c0_28] : memref<8x32x32xf32, #tpu.memory_space<vmem>>, vector<1x32x32xf32>
    %42 = vector.shape_cast %41 : vector<1x32x32xf32> to vector<32x32xf32>
    %43 = vector.shape_cast %40 : vector<32x32xf32> to vector<1x32x32xf32>
    tpu.vector_store %arg4[%c4, %c0_27, %c0_28], %43 {strides = array<i32>} : memref<8x32x32xf32, #tpu.memory_space<vmem>>, vector<1x32x32xf32>,
    %44 = vector.extract_strided_slice %23 {offsets = [0, 160], sizes = [32, 32], strides = [1, 1]} : vector<32x256xf32> to vector<32x32xf32>
    %c5 = arith.constant 5 : index
    %c0_29 = arith.constant 0 : index
    %c0_30 = arith.constant 0 : index
    %45 = vector.load %arg4[%c5, %c0_29, %c0_30] : memref<8x32x32xf32, #tpu.memory_space<vmem>>, vector<1x32x32xf32>
    %46 = vector.shape_cast %45 : vector<1x32x32xf32> to vector<32x32xf32>
    %47 = vector.shape_cast %44 : vector<32x32xf32> to vector<1x32x32xf32>
    tpu.vector_store %arg4[%c5, %c0_29, %c0_30], %47 {strides = array<i32>} : memref<8x32x32xf32, #tpu.memory_space<vmem>>, vector<1x32x32xf32>,
    %48 = vector.extract_strided_slice %23 {offsets = [0, 192], sizes = [32, 32], strides = [1, 1]} : vector<32x256xf32> to vector<32x32xf32>
    %c6 = arith.constant 6 : index
    %c0_31 = arith.constant 0 : index
    %c0_32 = arith.constant 0 : index
    %49 = vector.load %arg4[%c6, %c0_31, %c0_32] : memref<8x32x32xf32, #tpu.memory_space<vmem>>, vector<1x32x32xf32>
    %50 = vector.shape_cast %49 : vector<1x32x32xf32> to vector<32x32xf32>
    %51 = vector.shape_cast %48 : vector<32x32xf32> to vector<1x32x32xf32>
    tpu.vector_store %arg4[%c6, %c0_31, %c0_32], %51 {strides = array<i32>} : memref<8x32x32xf32, #tpu.memory_space<vmem>>, vector<1x32x32xf32>,
    %52 = vector.extract_strided_slice %23 {offsets = [0, 224], sizes = [32, 32], strides = [1, 1]} : vector<32x256xf32> to vector<32x32xf32>
    %c7 = arith.constant 7 : index
    %c0_33 = arith.constant 0 : index
    %c0_34 = arith.constant 0 : index
    %53 = vector.load %arg4[%c7, %c0_33, %c0_34] : memref<8x32x32xf32, #tpu.memory_space<vmem>>, vector<1x32x32xf32>
    %54 = vector.shape_cast %53 : vector<1x32x32xf32> to vector<32x32xf32>
    %55 = vector.shape_cast %52 : vector<32x32xf32> to vector<1x32x32xf32>
    tpu.vector_store %arg4[%c7, %c0_33, %c0_34], %55 {strides = array<i32>} : memref<8x32x32xf32, #tpu.memory_space<vmem>>, vector<1x32x32xf32>,
    return
  }
  func.func @transform_0(%arg0: i32) -> (i32, i32) {
    %c0_i32 = arith.constant 0 : i32
    %c0_i32_0 = arith.constant 0 : i32
    %c0_i32_1 = arith.constant 0 : i32
    return %c0_i32, %c0_i32_0 : i32, i32
  }
  func.func @transform_1(%arg0: i32) -> (i32, i32) {
    %c0_i32 = arith.constant 0 : i32
    %c0_i32_0 = arith.constant 0 : i32
    %c0_i32_1 = arith.constant 0 : i32
    return %c0_i32, %c0_i32_0 : i32, i32
  }
  func.func @transform_2(%arg0: i32) -> (i32, i32, i32) {
    %c0_i32 = arith.constant 0 : i32
    %c0_i32_0 = arith.constant 0 : i32
    %c0_i32_1 = arith.constant 0 : i32
    return %arg0, %c0_i32, %c0_i32_0 : i32, i32, i32
  }
  func.func @transform_3(%arg0: i32) -> (i32, i32, i32) {
    %c0_i32 = arith.constant 0 : i32
    %c0_i32_0 = arith.constant 0 : i32
    %c0_i32_1 = arith.constant 0 : i32
    return %arg0, %c0_i32, %c0_i32_0 : i32, i32, i32
  }
}

</mosaic_0001>

<bundles_post_ra>
// kernel: tpu_custom_call.1
= control target key start
LH: loop header
LB: loop body
LE: loop exit
PB: predicated region body
PF: predicated region fallthrough
CT: control target
= control target key end

     0   :  { %8 = vsyncpa [#allocation4], 0  ;;  %s834_s0 = inlined_call_operand.hbm [shape: bf16[32,16], index: 0, kind: input, shape index: {}]   ;;  %s835_s1 = inlined_call_operand.hbm [shape: bf16[16,32], index: 1, kind: input, shape index: {}]   ;;  %s836_s2 = inlined_call_operand.hbm [shape: bf16[8,16,16], index: 2, kind: input, shape index: {}]   ;;  %s837_s3 = inlined_call_operand.hbm [shape: f32[8,32,32], index: 3, kind: output, shape index: {}]  }
   0x1   :  { %9 = vsyncpa [#allocation7], 0 }
   0x2   :  { %10 = vsyncpa [#allocation5], 0  ;;  %s665_s12 = smov [#allocation6]   ;;  %s666_s14 = smov [#allocation3]  }
   0x3   :  { %s28_s13 = sshll.u32 %s665_s12, 4  ;;  %s16_s15 = sshll.u32 %s666_s14, 4  ;;  %s29_s13 = int_to_ptr.vmem [resolvable:$true] %s28_s13  ;;  %s696_s15 = int_to_ptr.vmem [resolvable:$true] %s16_s15 }
   0x4   :  { %s571_s18 = scalar_lea.hbm %s835_s1, 128 }
   0x5   :  { %p572_p0 = scmp.ne.s32.totalorder %s835_s1, %s571_s18  ;;  %p575_p1 = scmp.lt.u32.totalorder %s571_s18, %s835_s1 }
   0x7   :  { %p577_p2 = pnand %p575_p1, %p572_p0 }
   0x9   :  { %580 = shalt.err (!%p577_p2)
}
   0xa   :  { %s581_s23 = scalar_lea.vmem %s29_s13, 128  ;;  %p586_p4 = scmp.lt.s32.totalorder %s29_s13, %s29_s13 }
   0xb   :  { %p582_p3 = scmp.ne.s32.totalorder %s29_s13, %s581_s23  ;;  %p587_p5 = scmp.lt.s32.totalorder %s581_s23, %s581_s23 }
   0xd   :  { %p588_p6 = por %p587_p5, %p586_p4 }
   0xf   :  { %p589_p7 = pnand %p588_p6, %p582_p3 }
  0x11   :  { %592 = shalt.err (!%p589_p7)
}
  0x12   :  { %s667_s24 = smov 64   ;;  %s668_s25 = smov 4  }
  0x13   :  { %34 = dma.hbm_to_vmem [thread:$0]  %s835_s1, 128, %s29_s13, [#allocation7], %s667_s24, %s667_s24, %s668_s25  }
  0x14   :  { %s593_s30 = scalar_lea.hbm %s834_s0, 256 }
  0x15   :  { %p594_p8 = scmp.ne.s32.totalorder %s834_s0, %s593_s30  ;;  %p597_p9 = scmp.lt.u32.totalorder %s593_s30, %s834_s0 }
  0x17   :  { %p599_p10 = pnand %p597_p9, %p594_p8 }
  0x19   :  { %602 = shalt.err (!%p599_p10)
}
  0x1a   :  { %s603_s8 = scalar_lea.vmem %s696_s15, 256  ;;  %p608_p12 = scmp.lt.s32.totalorder %s696_s15, %s696_s15 }
  0x1b   :  { %p604_p11 = scmp.ne.s32.totalorder %s696_s15, %s603_s8  ;;  %p609_p13 = scmp.lt.s32.totalorder %s603_s8, %s603_s8 }
  0x1d   :  { %p610_p0 = por %p609_p13, %p608_p12 }
  0x1f   :  { %p611_p1 = pnand %p610_p0, %p604_p11 }
  0x21   :  { %614 = shalt.err (!%p611_p1)
}
  0x22   :  { %22 = dma.hbm_to_vmem [thread:$0]  %s834_s0, 256, %s696_s15, [#allocation4], %s667_s24, %s667_s24, %s668_s25  }
  0x23   :  { %s669_s10 = smov [#allocation8]   ;;  %s615_s14 = scalar_lea.hbm %s836_s2, 1024 }
  0x24   :  { %s40_s11 = sshll.u32 %s669_s10, 4  ;;  %p616_p2 = scmp.ne.s32.totalorder %s836_s2, %s615_s14  ;;  %s41_s11 = int_to_ptr.vmem [resolvable:$true] %s40_s11 }
  0x25   :  { %p619_p3 = scmp.lt.u32.totalorder %s615_s14, %s836_s2 }
  0x27   :  { %p621_p4 = pnand %p619_p3, %p616_p2 }
  0x29   :  { %624 = shalt.err (!%p621_p4)
}
  0x2a   :  { %s625_s20 = scalar_lea.vmem %s41_s11, 1024  ;;  %p630_p6 = scmp.lt.s32.totalorder %s41_s11, %s41_s11 }
  0x2b   :  { %p626_p5 = scmp.ne.s32.totalorder %s41_s11, %s625_s20  ;;  %p631_p7 = scmp.lt.s32.totalorder %s625_s20, %s625_s20 }
  0x2d   :  { %p632_p8 = por %p631_p7, %p630_p6 }
  0x2f   :  { %p633_p9 = pnand %p632_p8, %p626_p5 }
  0x31   :  { %636 = shalt.err (!%p633_p9)
}
  0x32   :  { %46 = dma.hbm_to_vmem [thread:$0]  %s836_s2, 1024, %s41_s11, [#allocation7], %s667_s24, %s667_s24, %s668_s25  }
  0x33   :  { %659 = dma.done.wait [#allocation4], 256  }
  0x34   :  { %660 = vsyncadd [#allocation4], 4294967040 }
  0x35   :  { %661 = dma.done.wait [#allocation7], 1152  }
  0x36   :  { %662 = vsyncadd [#allocation7], 4294966144  ;;  %v560_v0 = vld [vmem:[#allocation6] sm:$0xff]   ;;  %vm121_vm0 = vcmask 130048   ;;  %v561_v1 = vld [vmem:[#allocation8] sm:$0xff]   ;;  %vm251_vm1 = vcmask 261120  }
  0x37   :  { %529 = vmatprep.subr.bf16.mxu0 %v560_v0  ;;  %547 = vmatprep.subr.bf16.mxu1 %v560_v0  ;;  %v562_v2 = vld [vmem:[#allocation8 + $0x8] sm:$0xff]   ;;  %v563_v3 = vld [vmem:[#allocation8 + $0x30] sm:$0xff]   ;;  %v564_v4 = vld [vmem:[#allocation8 + $0x38] sm:$0xff]   ;;  %s670_s2 = smov 32   ;;  %s671_s21 = smov 96   ;;  %v672_v33 = vmov 0  }
  0x38   :  { %530 = vmatpush3.bf16.msra.mxu0 %v560_v0  ;;  %531 = vmatprep.mubr.msk.bf16.mxu0 %vm121_vm0, %v561_v1  ;;  %v565_v5 = vld [vmem:[#allocation8 + $0x10] sm:$0xff]   ;;  %v566_v6 = vld [vmem:[#allocation8 + $0x18] sm:$0xff]   ;;  %v567_v7 = vld [vmem:[#allocation8 + $0x20] sm:$0xff]   ;;  %vm257_vm2 = vcmask 523520   ;;  %vm263_vm3 = vcmask 785920   ;;  %vm269_vm4 = vcmask 1048320  }
  0x39   :  { %548 = vmatpush3.bf16.msra.mxu1 %v560_v0  ;;  %543 = vmatprep.mubr.msk.bf16.mxu1 %vm121_vm0, %v563_v3  ;;  %v568_v8 = vld [vmem:[#allocation8 + $0x28] sm:$0xff]   ;;  %v570_v43 = vld [vmem:[#allocation3 + $0x8] sm:$0xff]   ;;  %s673_s22 = smov [#allocation9]  }
  0x3a   :  { %v569_v42 = vld [vmem:[#allocation3] sm:$0xff]   ;;  %s486_s23 = sshll.u32 %s673_s22, 4  ;;  %s487_s23 = int_to_ptr.vmem [resolvable:$true] %s486_s23 }
  0x3b   :  { %532 = vmatmul.mubr.msk.bf16.vlgmr.msra.gmra.mrb[0].mxu0 %vm121_vm0, %v562_v2  ;;  %p642_p11 = scmp.lt.s32.totalorder %s487_s23, %s487_s23 }
  0x3c   :  { %544 = vmatmul.mubr.msk.bf16.vlgmr.msra.gmra.mrb[0].mxu1 %vm121_vm0, %v564_v4  ;;  %535 = vmatprep.mubr.msk.bf16.mxu0 %vm121_vm0, %v565_v5 }
  0x3d   :  { %341 = vmatprep.mubr.bf16.mxu1 %v672_v33 }
  0x43   :  { %536 = vmatmul.mubr.msk.bf16.gmra.mrb[4].mxu0 %vm121_vm0, %v566_v6 }
  0x44   :  { %539 = vmatprep.mubr.msk.bf16.mxu0 %vm121_vm0, %v567_v7 }
  0x4b   :  { %540 = vmatmul.mubr.msk.bf16.gmra.mrb[8].mxu0 %vm121_vm0, %v568_v8 }
 0x10e   :  { %v533_v9 = vpop.f32.mrb[0].mxu0 }
 0x10f   :  { %v180_v10 = vpop.f32.mrb[1].mxu0  ;;  %v545_v11 = vpop.f32.mrb[0].mxu1 }
 0x110   :  { %v534_v12 = vpop.f32.mrb[2].mxu0  ;;  %v228_v13 = vpop.f32.mrb[1].mxu1 }
 0x111   :  { %v244_v14 = vpack.c.bf16 %v534_v12, %v533_v9  ;;  %v183_v15 = vpop.f32.mrb[3].mxu0  ;;  %v546_v16 = vpop.f32.mrb[2].mxu1 }
 0x112   :  { %v243_v17 = vpack.c.bf16 %v183_v15, %v180_v10  ;;  %v250_v18 = vpack.c.bf16 %v546_v16, %v545_v11  ;;  %v231_v19 = vpop.f32.mrb[3].mxu1 }
 0x113   :  { %254 = vrot.lane.b32.xlu0 %v244_v14, %s670_s2  ;;  %v249_v20 = vpack.c.bf16 %v231_v19, %v228_v13 }
 0x114   :  { %252 = vst.msk [vmem:[#allocation2] sm:$0xff] %vm251_vm1, %v243_v17 }
 0x115   :  { %278 = vrot.lane.b32.xlu1 %v249_v20, %s667_s24 }
 0x116   :  { %v537_v21 = vpop.f32.mrb[4].mxu0 }
 0x117   :  { %v196_v22 = vpop.f32.mrb[5].mxu0 }
 0x118   :  { %v538_v23 = vpop.f32.mrb[6].mxu0 }
 0x119   :  { %v246_v24 = vpack.c.bf16 %v538_v23, %v537_v21  ;;  %v199_v25 = vpop.f32.mrb[7].mxu0 }
 0x11a   :  { %v245_v26 = vpack.c.bf16 %v199_v25, %v196_v22 }
 0x11c   :  { %260 = vrot.lane.b32.xlu1 %v245_v26, %s667_s24 }
 0x11e   :  { %v541_v27 = vpop.f32.mrb[8].mxu0 }
 0x11f   :  { %v212_v28 = vpop.f32.mrb[9].mxu0 }
 0x120   :  { %266 = vrot.lane.b32.xlu1 %v246_v24, %s671_s21  ;;  %v542_v29 = vpop.f32.mrb[10].mxu0 }
 0x121   :  { %v248_v30 = vpack.c.bf16 %v542_v29, %v541_v27  ;;  %v215_v31 = vpop.f32.mrb[11].mxu0 }
 0x122   :  { %v247_v32 = vpack.c.bf16 %v215_v31, %v212_v28 }
 0x123   :  { %273 = vrot.lane.b32.xlu0 %v248_v30, %s670_s2 }
 0x124   :  { %271 = vst.msk [vmem:[#allocation2 + $0x8] sm:$0xff] %vm251_vm1, %v247_v32 }
 0x127   :  { %283 = vrot.lane.b32.xlu0 %v250_v18, %s671_s21 }
 0x185   :  { %v255_v34 = vpop.permute.xlu0 %254 }
 0x186   :  { %258 = vst.msk [vmem:[#allocation2] sm:$0xff] %vm257_vm2, %v255_v34 }
 0x187   :  { %v279_v35 = vpop.permute.xlu1 %278 }
 0x18e   :  { %v261_v36 = vpop.permute.xlu1 %260 }
 0x18f   :  { %264 = vst.msk [vmem:[#allocation2] sm:$0xff] %vm263_vm3, %v261_v36 }
 0x192   :  { %v267_v37 = vpop.permute.xlu1 %266 }
 0x193   :  { %270 = vst.msk [vmem:[#allocation2] sm:$0xff] %vm269_vm4, %v267_v37 }
 0x195   :  { %v274_v38 = vpop.permute.xlu0 %273 }
 0x196   :  { %276 = vst.msk [vmem:[#allocation2 + $0x8] sm:$0xff] %vm257_vm2, %v274_v38 }
 0x197   :  { %281 = vst.msk [vmem:[#allocation2 + $0x8] sm:$0xff] %vm263_vm3, %v279_v35 }
 0x199   :  { %v284_v39 = vpop.permute.xlu0 %283 }
 0x19a   :  { %286 = vst.msk [vmem:[#allocation2 + $0x8] sm:$0xff] %vm269_vm4, %v284_v39  ;;  %v291_v41 = vld [vmem:[#allocation2] sm:$0xff] }
 0x1a1   :  { %v292_v40 = vld [vmem:[#allocation2 + $0x8] sm:$0xff] }
 0x1a2   :  { %309 = vmatprep.subr.bf16.mxu1 %v292_v40 }
 0x1a3   :  { %310 = vmatpush1.bf16.msra.mxu1 %v291_v41 }
 0x1a6   :  { %518 = vmatmul.mubr.msk.bf16.vlgmr.msra.gmra.mrb[4].mxu1 %vm121_vm0, %v569_v42 }
 0x1a7   :  { %351 = vmatprep.mubr.bf16.mxu1 %v672_v33 }
 0x1ae   :  { %519 = vmatmul.mubr.msk.bf16.gmra.mrb[8].mxu1 %vm121_vm0, %v570_v43 }
 0x279   :  { %v343_v44 = vpop.f32.mrb[4].mxu1 }
 0x27a   :  { %362 = vst.msk [vmem:[#allocation9] sm:$0xff] %vm251_vm1, %v343_v44  ;;  %370 = vrot.lane.b32.xlu0 %v343_v44, %s671_s21  ;;  %v345_v45 = vpop.f32.mrb[5].mxu1 }
 0x27b   :  { %422 = vst.msk [vmem:[#allocation9 + $0x80] sm:$0xff] %vm251_vm1, %v345_v45  ;;  %v347_v46 = vpop.f32.mrb[6].mxu1 }
 0x27c   :  { %363 = vst.msk [vmem:[#allocation9 + $0x8] sm:$0xff] %vm251_vm1, %v347_v46  ;;  %372 = vrot.lane.b32.xlu1 %v347_v46, %s671_s21  ;;  %v349_v47 = vpop.f32.mrb[7].mxu1 }
 0x27d   :  { %423 = vst.msk [vmem:[#allocation9 + $0x88] sm:$0xff] %vm251_vm1, %v349_v47 }
 0x27e   :  { %387 = vrot.lane.b32.xlu0 %v343_v44, %s667_s24 }
 0x280   :  { %389 = vrot.lane.b32.xlu1 %v347_v46, %s667_s24 }
 0x281   :  { %v353_v48 = vpop.f32.mrb[8].mxu1 }
 0x282   :  { %404 = vrot.lane.b32.xlu0 %v343_v44, %s670_s2  ;;  %364 = vst.msk [vmem:[#allocation9 + $0x10] sm:$0xff] %vm251_vm1, %v353_v48  ;;  %v355_v49 = vpop.f32.mrb[9].mxu1 }
 0x283   :  { %424 = vst.msk [vmem:[#allocation9 + $0x90] sm:$0xff] %vm251_vm1, %v355_v49  ;;  %v357_v50 = vpop.f32.mrb[10].mxu1 }
 0x284   :  { %406 = vrot.lane.b32.xlu1 %v347_v46, %s670_s2  ;;  %365 = vst.msk [vmem:[#allocation9 + $0x18] sm:$0xff] %vm251_vm1, %v357_v50  ;;  %v359_v51 = vpop.f32.mrb[11].mxu1 }
 0x285   :  { %425 = vst.msk [vmem:[#allocation9 + $0x98] sm:$0xff] %vm251_vm1, %v359_v51 }
 0x286   :  { %430 = vrot.lane.b32.xlu0 %v345_v45, %s671_s21 }
 0x288   :  { %432 = vrot.lane.b32.xlu1 %v349_v47, %s671_s21 }
 0x28a   :  { %447 = vrot.lane.b32.xlu0 %v345_v45, %s667_s24 }
 0x28c   :  { %449 = vrot.lane.b32.xlu1 %v349_v47, %s667_s24 }
 0x28e   :  { %464 = vrot.lane.b32.xlu0 %v345_v45, %s670_s2 }
 0x290   :  { %466 = vrot.lane.b32.xlu1 %v349_v47, %s670_s2 }
 0x292   :  { %374 = vrot.lane.b32.xlu0 %v353_v48, %s671_s21 }
 0x294   :  { %376 = vrot.lane.b32.xlu1 %v357_v50, %s671_s21 }
 0x296   :  { %391 = vrot.lane.b32.xlu0 %v353_v48, %s667_s24 }
 0x298   :  { %393 = vrot.lane.b32.xlu1 %v357_v50, %s667_s24 }
 0x29a   :  { %408 = vrot.lane.b32.xlu0 %v353_v48, %s670_s2 }
 0x29c   :  { %410 = vrot.lane.b32.xlu1 %v357_v50, %s670_s2 }
 0x29e   :  { %434 = vrot.lane.b32.xlu0 %v355_v49, %s671_s21 }
 0x2a0   :  { %436 = vrot.lane.b32.xlu1 %v359_v51, %s671_s21 }
 0x2a2   :  { %451 = vrot.lane.b32.xlu0 %v355_v49, %s667_s24 }
 0x2a4   :  { %453 = vrot.lane.b32.xlu1 %v359_v51, %s667_s24  ;;  %s637_s24 = scalar_lea.vmem %s487_s23, 4096 }
 0x2a5   :  { %p638_p10 = scmp.ne.s32.totalorder %s487_s23, %s637_s24  ;;  %p643_p12 = scmp.lt.s32.totalorder %s637_s24, %s637_s24 }
 0x2a6   :  { %468 = vrot.lane.b32.xlu0 %v355_v49, %s670_s2 }
 0x2a7   :  { %p644_p13 = por %p643_p12, %p642_p11 }
 0x2a8   :  { %470 = vrot.lane.b32.xlu1 %v359_v51, %s670_s2 }
 0x2a9   :  { %p645_p0 = pnand %p644_p13, %p638_p10 }
 0x2ec   :  { %v371_v52 = vpop.permute.xlu0 %370 }
 0x2ed   :  { %383 = vst.msk [vmem:[#allocation9 + $0x20] sm:$0xff] %vm251_vm1, %v371_v52 }
 0x2ee   :  { %v373_v53 = vpop.permute.xlu1 %372 }
 0x2ef   :  { %384 = vst.msk [vmem:[#allocation9 + $0x28] sm:$0xff] %vm251_vm1, %v373_v53 }
 0x2f0   :  { %v388_v54 = vpop.permute.xlu0 %387 }
 0x2f1   :  { %400 = vst.msk [vmem:[#allocation9 + $0x40] sm:$0xff] %vm251_vm1, %v388_v54 }
 0x2f2   :  { %v390_v55 = vpop.permute.xlu1 %389 }
 0x2f3   :  { %401 = vst.msk [vmem:[#allocation9 + $0x48] sm:$0xff] %vm251_vm1, %v390_v55 }
 0x2f4   :  { %v405_v56 = vpop.permute.xlu0 %404 }
 0x2f5   :  { %417 = vst.msk [vmem:[#allocation9 + $0x60] sm:$0xff] %vm251_vm1, %v405_v56 }
 0x2f6   :  { %v407_v57 = vpop.permute.xlu1 %406 }
 0x2f7   :  { %418 = vst.msk [vmem:[#allocation9 + $0x68] sm:$0xff] %vm251_vm1, %v407_v57 }
 0x2f8   :  { %v431_v58 = vpop.permute.xlu0 %430 }
 0x2f9   :  { %443 = vst.msk [vmem:[#allocation9 + $0xa0] sm:$0xff] %vm251_vm1, %v431_v58 }
 0x2fa   :  { %v433_v59 = vpop.permute.xlu1 %432 }
 0x2fb   :  { %444 = vst.msk [vmem:[#allocation9 + $0xa8] sm:$0xff] %vm251_vm1, %v433_v59 }
 0x2fc   :  { %v448_v60 = vpop.permute.xlu0 %447 }
 0x2fd   :  { %460 = vst.msk [vmem:[#allocation9 + $0xc0] sm:$0xff] %vm251_vm1, %v448_v60 }
 0x2fe   :  { %v450_v61 = vpop.permute.xlu1 %449 }
 0x2ff   :  { %461 = vst.msk [vmem:[#allocation9 + $0xc8] sm:$0xff] %vm251_vm1, %v450_v61 }
 0x300   :  { %v465_v62 = vpop.permute.xlu0 %464 }
 0x301   :  { %477 = vst.msk [vmem:[#allocation9 + $0xe0] sm:$0xff] %vm251_vm1, %v465_v62 }
 0x302   :  { %v467_v63 = vpop.permute.xlu1 %466 }
 0x303   :  { %478 = vst.msk [vmem:[#allocation9 + $0xe8] sm:$0xff] %vm251_vm1, %v467_v63 }
 0x304   :  { %v375_v0 = vpop.permute.xlu0 %374 }
 0x305   :  { %385 = vst.msk [vmem:[#allocation9 + $0x30] sm:$0xff] %vm251_vm1, %v375_v0 }
 0x306   :  { %v377_v1 = vpop.permute.xlu1 %376 }
 0x307   :  { %386 = vst.msk [vmem:[#allocation9 + $0x38] sm:$0xff] %vm251_vm1, %v377_v1 }
 0x308   :  { %v392_v2 = vpop.permute.xlu0 %391 }
 0x309   :  { %402 = vst.msk [vmem:[#allocation9 + $0x50] sm:$0xff] %vm251_vm1, %v392_v2 }
 0x30a   :  { %v394_v3 = vpop.permute.xlu1 %393 }
 0x30b   :  { %403 = vst.msk [vmem:[#allocation9 + $0x58] sm:$0xff] %vm251_vm1, %v394_v3 }
 0x30c   :  { %v409_v4 = vpop.permute.xlu0 %408 }
 0x30d   :  { %419 = vst.msk [vmem:[#allocation9 + $0x70] sm:$0xff] %vm251_vm1, %v409_v4 }
 0x30e   :  { %v411_v5 = vpop.permute.xlu1 %410 }
 0x30f   :  { %420 = vst.msk [vmem:[#allocation9 + $0x78] sm:$0xff] %vm251_vm1, %v411_v5 }
 0x310   :  { %v435_v6 = vpop.permute.xlu0 %434 }
 0x311   :  { %445 = vst.msk [vmem:[#allocation9 + $0xb0] sm:$0xff] %vm251_vm1, %v435_v6 }
 0x312   :  { %v437_v7 = vpop.permute.xlu1 %436 }
 0x313   :  { %446 = vst.msk [vmem:[#allocation9 + $0xb8] sm:$0xff] %vm251_vm1, %v437_v7 }
 0x314   :  { %v452_v8 = vpop.permute.xlu0 %451 }
 0x315   :  { %462 = vst.msk [vmem:[#allocation9 + $0xd0] sm:$0xff] %vm251_vm1, %v452_v8 }
 0x316   :  { %v454_v9 = vpop.permute.xlu1 %453 }
 0x317   :  { %463 = vst.msk [vmem:[#allocation9 + $0xd8] sm:$0xff] %vm251_vm1, %v454_v9 }
 0x318   :  { %v469_v10 = vpop.permute.xlu0 %468 }
 0x319   :  { %479 = vst.msk [vmem:[#allocation9 + $0xf0] sm:$0xff] %vm251_vm1, %v469_v10 }
 0x31a   :  { %v471_v11 = vpop.permute.xlu1 %470 }
 0x31b   :  { %480 = vst.msk [vmem:[#allocation9 + $0xf8] sm:$0xff] %vm251_vm1, %v471_v11 }
 0x31c   :  { %648 = shalt.err (!%p645_p0)
}
 0x31d   :  { %s649_s27 = scalar_lea.hbm %s837_s3, 4096 }
 0x31e   :  { %p650_p1 = scmp.ne.s32.totalorder %s837_s3, %s649_s27  ;;  %p653_p2 = scmp.lt.u32.totalorder %s649_s27, %s837_s3 }
 0x320   :  { %p655_p3 = pnand %p653_p2, %p650_p1 }
 0x322   :  { %658 = shalt.err (!%p655_p3)
}
 0x323   :  { %s674_s5 = smov 128   ;;  %s675_s6 = smov 8  }
 0x324   :  { %492 = dma.vmem_to_hbm [thread:$0]  %s487_s23, 4096, %s837_s3, [#allocation5], %s674_s5, %s674_s5, %s675_s6  }
 0x325   :  { %663 = dma.done.wait [#allocation5], 4096  }
 0x326   :  { %664 = vsyncadd [#allocation5], 4294963200 }
 0x327   :  { %496 = vsyncpa [#allocation4], 1 }
 0x328   :  { %497 = vsyncpa [#allocation7], 1 }
 0x329   :  { %498 = vsyncpa [#allocation5], 1 }

</bundles_post_ra>
